<compile_context>
chip_gen: v7x
topology: tpu7x:2x2x1
jax: 0.10.0
libtpu: 0.0.40
codegen_flags: <defaults>
</compile_context>

<pallas_src>
import math

import jax
import jax.numpy as jnp
from jax.experimental import pallas as pl
from jax.experimental.pallas import tpu as pltpu

_PACK = 8  # positions packed per output row (sublane count)


# ----------------------------- Pallas kernel -------------------------------

def _rope_outer_kernel(t_ref, f_ref, o_ref):
    # t_ref: (TR, P)   f32 packed positions
    # f_ref: (1, P*F)  f32 freqs tiled P times: f_ref[0, p*F + k] == freqs[k]
    # o_ref: (TR, P*F) f32, o[r, p*F + k] = t[r, p] * freqs[k]
    tr, p = t_ref.shape
    lanes = o_ref.shape[-1]
    f_per = lanes // p
    # Broadcast each packed position across its F lanes, then flatten to the
    # lane-dense row layout.  Single full-width multiply + unmasked store.
    t_b = jnp.broadcast_to(t_ref[...][:, :, None], (tr, p, f_per)).reshape(tr, lanes)
    o_ref[...] = t_b * f_ref[...]


def triangle_rope_forward(t, freqs, *, tile_rows=2048):
    """Pallas equivalent of TriangleRotaryEmbedding.forward.

    Returns float32 array of shape (*t.shape, dim // 2).
    """
    orig_shape = t.shape
    F = freqs.shape[0]
    lanes = _PACK * F  # == 128 when dim == 32 (F == 16)

    t_flat = t.reshape(-1).astype(jnp.float32)
    N = t_flat.shape[0]

    # Pack 8 positions per row.  Only a tiny (<8 elem) tail pad when needed.
    n_rows = pl.cdiv(N, _PACK)
    n_pad = n_rows * _PACK
    if n_pad != N:
        t_flat = jnp.pad(t_flat, (0, n_pad - N))
    t2d = t_flat.reshape(n_rows, _PACK)

    # Lane-dense resident freqs row: [f0..f_{F-1}] repeated _PACK times.
    f_row = jnp.tile(freqs.astype(jnp.float32).reshape(1, F), (1, _PACK))

    # Tile rows: full extent if it fits, otherwise a sublane-aligned tile.
    if n_rows <= tile_rows:
        tr = n_rows
    else:
        tr = max(_PACK, (tile_rows // _PACK) * _PACK)
    grid_m = pl.cdiv(n_rows, tr)

    out = pl.pallas_call(
        _rope_outer_kernel,
        out_shape=jax.ShapeDtypeStruct((n_rows, lanes), jnp.float32),
        grid_spec=pltpu.PrefetchScalarGridSpec(
            num_scalar_prefetch=0,
            grid=(grid_m,),
            in_specs=[
                # (TR, 8): contiguous, sublane-dense position block.
                pl.BlockSpec((tr, _PACK), lambda i: (i, 0)),
                # freqs row is small and resident for every grid step.
                pl.BlockSpec((1, lanes), lambda i: (0, 0)),
            ],
            # Lane-dense output slab: unmasked full-vreg stores.
            out_specs=pl.BlockSpec((tr, lanes), lambda i: (i, 0)),
        ),
        compiler_params=pltpu.CompilerParams(
            dimension_semantics=("parallel",)),
    )(t2d, f_row)

    # (n_rows, 8*F) row-major bytes == (n_rows*8, F) row-major bytes -> free view.
    out_flat = out.reshape(n_pad, F)
    if n_pad != N:
        out_flat = out_flat[:N]
    return out_flat.reshape(*orig_shape, F)


# --------------------------- module-level glue ------------------------------

def make_triangle_rope_freqs(dim, double_max_freq=False):
    """Deterministic parameter init, matching TriangleRotaryEmbedding.__init__."""
    max_freq = math.log2(dim - 1) if double_max_freq else math.log2(dim // 2 - 1)
    return (2.0 ** jnp.linspace(0.0, max_freq, dim // 2)).astype(jnp.float32)


def get_triangle_freqs(pos, freqs, hf_format=True):
    """TriangleRotaryEmbedding.get_triangle_freqs (rearrange/concat are glue)."""
    # TODO(synk): for max perf, fuse the duplication (and cos/sin) into the
    # downstream rotary-application kernel instead of materializing it here.
    f = triangle_rope_forward(pos, freqs)            # (b, n_tris, n_verts, d)
    b, nt, nv, d = f.shape
    f = f.reshape(b, 1, nt, nv * d)                  # 'b t v d -> b 1 t (v d)'
    if hf_format:
        f = jnp.concatenate([f, f], axis=-1)
    else:
        f = jnp.repeat(f, 2, axis=-1)                # '... f -> ... (f r)', r=2
    return f


# --------------------------------- main -------------------------------------

if __name__ == "__main__":
    dim = 32                       # rotary dim -> F = dim // 2 = 16 freqs
    batch, n_tris, n_verts = 2, 8, 3

    key = jax.random.PRNGKey(0)
    # triangle vertex positions (any real-valued "t" is legal for forward)
    pos = jax.random.uniform(key, (batch, n_tris, n_verts), dtype=jnp.float32,
                             minval=0.0, maxval=10.0)

    freqs = make_triangle_rope_freqs(dim)            # (16,), deterministic

    # Pallas forward
    out = triangle_rope_forward(pos, freqs)
    out = jax.block_until_ready(out)

    # Pure-JAX reference: einsum('..., f -> ... f', t, freqs)
    ref = jnp.einsum('btv,f->btvf', pos.astype(jnp.float32), freqs)
    assert out.shape == (batch, n_tris, n_verts, dim // 2)
    assert out.dtype == jnp.float32
    assert jnp.allclose(out, ref, atol=1e-6, rtol=1e-6)

    # Also a larger, non-multiple-of-tile shape to exercise tiling + tail handling.
    pos_big = jax.random.uniform(jax.random.PRNGKey(1), (4, 300, 3),
                                 dtype=jnp.float32, minval=0.0, maxval=10.0)
    out_big = jax.block_until_ready(triangle_rope_forward(pos_big, freqs,
                                                          tile_rows=64))
    ref_big = jnp.einsum('btv,f->btvf', pos_big, freqs)
    assert out_big.shape == ref_big.shape
    assert jnp.allclose(out_big, ref_big, atol=1e-6, rtol=1e-6)

    # Also exercise get_triangle_freqs (hf_format=True path)
    tri = jax.block_until_ready(get_triangle_freqs(pos, freqs, hf_format=True))
    tri_ref = jnp.concatenate(
        [ref.reshape(batch, 1, n_tris, n_verts * (dim // 2))] * 2, axis=-1)
    assert tri.shape == (batch, 1, n_tris, 2 * n_verts * (dim // 2))
    assert jnp.allclose(tri, tri_ref, atol=1e-6, rtol=1e-6)

    print("KERNEL_OK")
</pallas_src>

<mosaic_0001>
module attributes {stable_mosaic.version = 11 : i64} {
  func.func @_rope_outer_kernel(%arg0: i32, %arg1: memref<6x8xf32, #tpu.memory_space<vmem>>, %arg2: memref<1x128xf32, #tpu.memory_space<vmem>>, %arg3: memref<6x128xf32, #tpu.memory_space<vmem>>) attributes {dimension_semantics = [#tpu.dimension_semantics<parallel>], iteration_bounds = array<i64: 1>, scalar_prefetch = 0 : i64, scratch_operands = 0 : i64, tpu.core_type = #tpu.core_type<tc>, window_params = [{transform_indices = @transform_0, window_bounds = array<i64: 6, 8>}, {pipeline_mode = #tpu.pipeline_mode<synchronous>, transform_indices = @transform_1, window_bounds = array<i64: 1, 128>}, {transform_indices = @transform_2, window_bounds = array<i64: 6, 128>}]} {
    %c0 = arith.constant 0 : index
    %c0_0 = arith.constant 0 : index
    %0 = vector.load %arg1[%c0, %c0_0] : memref<6x8xf32, #tpu.memory_space<vmem>>, vector<6x8xf32>
    %1 = vector.shape_cast %0 : vector<6x8xf32> to vector<6x8x1xf32>
    %2 = vector.shape_cast %1 : vector<6x8x1xf32> to vector<6x8x1xf32>
    %3 = vector.broadcast %2 : vector<6x8x1xf32> to vector<6x8x16xf32>
    %4 = vector.shape_cast %3 : vector<6x8x16xf32> to vector<6x128xf32>
    %c0_1 = arith.constant 0 : index
    %c0_2 = arith.constant 0 : index
    %5 = vector.load %arg2[%c0_1, %c0_2] : memref<1x128xf32, #tpu.memory_space<vmem>>, vector<1x128xf32>
    %6 = vector.broadcast %5 : vector<1x128xf32> to vector<6x128xf32>
    %7 = arith.mulf %4, %6 : vector<6x128xf32>
    %c0_3 = arith.constant 0 : index
    %c0_4 = arith.constant 0 : index
    %8 = vector.load %arg3[%c0_3, %c0_4] : memref<6x128xf32, #tpu.memory_space<vmem>>, vector<6x128xf32>
    tpu.vector_store %arg3[%c0_3, %c0_4], %7 {strides = array<i32>} : memref<6x128xf32, #tpu.memory_space<vmem>>, vector<6x128xf32>,
    return
  }
  func.func @transform_0(%arg0: i32) -> (i32, i32) {
    %c0_i32 = arith.constant 0 : i32
    %c0_i32_0 = arith.constant 0 : i32
    return %arg0, %c0_i32 : i32, i32
  }
  func.func @transform_1(%arg0: i32) -> (i32, i32) {
    %c0_i32 = arith.constant 0 : i32
    %c0_i32_0 = arith.constant 0 : i32
    %c0_i32_1 = arith.constant 0 : i32
    return %c0_i32, %c0_i32_0 : i32, i32
  }
  func.func @transform_2(%arg0: i32) -> (i32, i32) {
    %c0_i32 = arith.constant 0 : i32
    %c0_i32_0 = arith.constant 0 : i32
    return %arg0, %c0_i32 : i32, i32
  }
}

</mosaic_0001>

<bundles_post_ra>
// kernel: tpu_custom_call.1
= control target key start
LH: loop header
LB: loop body
LE: loop exit
PB: predicated region body
PF: predicated region fallthrough
CT: control target
= control target key end

     0   :  { %7 = vsyncpa [#allocation3], 0  ;;  %s382_s0 = inlined_call_operand.hbm [shape: f32[6,8], index: 0, kind: input, shape index: {}]   ;;  %s383_s1 = inlined_call_operand.vmem [shape: f32[1,128], index: 1, kind: input, shape index: {}]   ;;  %s384_s2 = inlined_call_operand.hbm [shape: f32[6,128], index: 2, kind: output, shape index: {}]  }
   0x1   :  { %8 = vsyncpa [#allocation4], 0  ;;  %s328_s9 = smov [#allocation2]   ;;  %s280_s13 = scalar_lea.hbm %s382_s0, 128 }
   0x2   :  { %s15_s10 = sshll.u32 %s328_s9, 4  ;;  %p281_p0 = scmp.ne.s32.totalorder %s382_s0, %s280_s13  ;;  %s16_s10 = int_to_ptr.vmem [resolvable:$true] %s15_s10 }
   0x3   :  { %p284_p1 = scmp.lt.u32.totalorder %s280_s13, %s382_s0 }
   0x5   :  { %p286_p2 = pnand %p284_p1, %p281_p0 }
   0x7   :  { %289 = shalt.err (!%p286_p2)
}
   0x8   :  { %s290_s18 = scalar_lea.vmem %s16_s10, 128  ;;  %p295_p4 = scmp.lt.s32.totalorder %s16_s10, %s16_s10 }
   0x9   :  { %p291_p3 = scmp.ne.s32.totalorder %s16_s10, %s290_s18  ;;  %p296_p5 = scmp.lt.s32.totalorder %s290_s18, %s290_s18 }
   0xb   :  { %p297_p6 = por %p296_p5, %p295_p4 }
   0xd   :  { %p298_p7 = pnand %p297_p6, %p291_p3 }
   0xf   :  { %301 = shalt.err (!%p298_p7)
}
  0x10   :  { %18 = dma.hbm_to_vmem [thread:$0]  %s382_s0, 128, %s16_s10, [#allocation3]  }
  0x11   :  { %324 = dma.done.wait [#allocation3], 128  }
  0x12   :  { %325 = vsyncadd [#allocation3], 4294967168  ;;  %v25_v0 = vlaneseq  ;;  %v24_v6 = vld [vmem:[#allocation2] sm:$0x3f]  ;;  %v329_v15 = vmov 1983009808  }
  0x13   :  { %v70_v16 = vunpack.c.l.s4 %v329_v15  ;;  %v330_v20 = vmov 1934713408   ;;  %v331_v38 = vmov 0.0   ;;  %s332_s0 = smov 32   ;;  %s333_s21 = smov 16   ;;  %vm229_vm0 = vcmask 130048  }
  0x14   :  { %v26_v1 = vshrl.u32 %v25_v0, 7  ;;  %v132_v21 = vunpack.c.l.s4 %v330_v20  ;;  %s334_s22 = smov 48   ;;  %s335_s23 = smov 64   ;;  %vm231_vm1 = vcmask 261120   ;;  %vm233_vm2 = vcmask 392192  }
  0x15   :  { %v71_v17 = vunpack.c.0.s8 %v70_v16  ;;  %s336_s24 = smov 80   ;;  %s337_s25 = smov 96   ;;  %vm235_vm3 = vcmask 523264   ;;  %vm237_vm4 = vcmask 654336   ;;  %vm239_vm5 = vcmask 785408  }
  0x16   :  { %v41_v2 = vsub.s32 2, %v26_v1  ;;  %v27_v3 = vsub.s32 0, %v26_v1  ;;  %v48_v4 = vsub.s32 3, %v26_v1  ;;  %v34_v5 = vsub.s32 1, %v26_v1  ;;  %s338_s26 = smov 112   ;;  %s339_s29 = smov [#allocation5]  }
  0x17   :  { %v62_v11 = vsub.s32 5, %v26_v1  ;;  %v55_v12 = vsub.s32 4, %v26_v1  ;;  %v74_v22 = vsub.s32 %v71_v17, %v26_v1  ;;  %v133_v28 = vunpack.c.0.s8 %v132_v21  ;;  %v267_v15 = vld [vmem:[%s383_s1] ss:$0 sm:$0xff]  ;;  %s258_s30 = sshll.u32 %s339_s29, 4  ;;  %s259_s30 = int_to_ptr.vmem [resolvable:$true] %s258_s30 }
  0x18   :  { %v42_v7 = vrot.slane %v24_v6, %v41_v2  ;;  %v28_v8 = vrot.slane %v24_v6, %v27_v3  ;;  %v49_v9 = vrot.slane %v24_v6, %v48_v4  ;;  %v35_v10 = vrot.slane %v24_v6, %v34_v5  ;;  %s302_s3 = scalar_lea.vmem %s259_s30, 128  ;;  %p307_p9 = scmp.lt.s32.totalorder %s259_s30, %s259_s30 }
  0x19   :  { %v63_v13 = vrot.slane %v24_v6, %v62_v11  ;;  %v56_v14 = vrot.slane %v24_v6, %v55_v12  ;;  %v136_v37 = vsub.s32 %v133_v28, %v26_v1  ;;  %vm241_vm6 = vcmask 916480   ;;  %p303_p8 = scmp.ne.s32.totalorder %s259_s30, %s302_s3  ;;  %p308_p10 = scmp.lt.s32.totalorder %s302_s3, %s302_s3 }
  0x1a   :  { %44 = vbcast.lane.b32.xlu1 %v42_v7, 256  ;;  %30 = vbcast.lane.b32.xlu0 %v28_v8, 256 }
  0x1b   :  { %p309_p11 = por %p308_p10, %p307_p9 }
  0x1d   :  { %p310_p12 = pnand %p309_p11, %p303_p8 }
  0x1e   :  { %51 = vbcast.lane.b32.xlu1 %v49_v9, 256  ;;  %37 = vbcast.lane.b32.xlu0 %v35_v10, 256 }
  0x22   :  { %65 = vbcast.lane.b32.xlu1 %v63_v13, 256  ;;  %58 = vbcast.lane.b32.xlu0 %v56_v14, 256 }
  0x8c   :  { %v45_v18 = vpop.permute.xlu1 %44  ;;  %v31_v19 = vpop.permute.xlu0 %30 }
  0x8d   :  { %v67_v23 = vcombine.low %v31_v19, %v45_v18  ;;  %v68_v29 = vcombine.high %v31_v19, %v45_v18 }
  0x8f   :  { %v75_v30 = vrot.slane %v67_v23, %v74_v22  ;;  %v82_v43 = vrot.slane %v68_v29, %v74_v22 }
  0x90   :  { %v52_v24 = vpop.permute.xlu1 %51  ;;  %v38_v25 = vpop.permute.xlu0 %37 }
  0x91   :  { %v83_v26 = vcombine.low %v38_v25, %v52_v24  ;;  %v84_v27 = vcombine.high %v38_v25, %v52_v24 }
  0x93   :  { %v91_v31 = vrot.slane %v83_v26, %v74_v22  ;;  %v98_v34 = vrot.slane %v84_v27, %v74_v22 }
  0x94   :  { %v66_v32 = vpop.permute.xlu1 %65  ;;  %v59_v33 = vpop.permute.xlu0 %58 }
  0x95   :  { %v129_v35 = vcombine.low %v75_v30, %v91_v31  ;;  %v130_v36 = vcombine.high %v75_v30, %v91_v31  ;;  %v114_v39 = vcombine.high %v66_v32, %v331_v38  ;;  %v121_v40 = vrot.slane %v66_v32, %v74_v22 }
  0x96   :  { %v99_v41 = vcombine.high %v59_v33, %v331_v38  ;;  %v106_v42 = vrot.slane %v59_v33, %v74_v22  ;;  %v145_v48 = vcombine.low %v82_v43, %v98_v34  ;;  %v146_v59 = vcombine.high %v82_v43, %v98_v34 }
  0x97   :  { %v128_v44 = vrot.slane %v114_v39, %v74_v22  ;;  %v144_v49 = vrot.slane %v130_v36, %v136_v37  ;;  %v137_v53 = vrot.slane %v129_v35, %v136_v37 }
  0x98   :  { %v113_v45 = vrot.slane %v99_v41, %v74_v22  ;;  %v161_v46 = vcombine.low %v106_v42, %v121_v40  ;;  %v162_v47 = vcombine.high %v106_v42, %v121_v40  ;;  %v153_v60 = vrot.slane %v145_v48, %v136_v37 }
  0x99   :  { %v160_v0 = vrot.slane %v146_v59, %v136_v37 }
  0x9a   :  { %v169_v50 = vrot.slane %v161_v46, %v136_v37  ;;  %v176_v51 = vrot.slane %v162_v47, %v136_v37  ;;  %v177_v52 = vcombine.low %v113_v45, %v128_v44  ;;  %v178_v54 = vcombine.high %v113_v45, %v128_v44 }
  0x9c   :  { %v195_v55 = vcombine.low %v144_v49, %v176_v51  ;;  %v194_v56 = vcombine.high %v137_v53, %v169_v50  ;;  %v185_v57 = vrot.slane %v177_v52, %v136_v37  ;;  %v193_v58 = vcombine.low %v137_v53, %v169_v50 }
  0x9d   :  { %v196_v61 = vcombine.high %v144_v49, %v176_v51  ;;  %v192_v63 = vrot.slane %v178_v54, %v136_v37 }
  0x9e   :  { %206 = vrot.lane.b32.xlu1 %v195_v55, %s332_s0  ;;  %202 = vrot.lane.b32.xlu0 %v194_v56, %s333_s21  ;;  %v197_v62 = vcombine.low %v153_v60, %v185_v57  ;;  %v198_v1 = vcombine.high %v153_v60, %v185_v57 }
  0x9f   :  { %v199_v2 = vcombine.low %v160_v0, %v192_v63  ;;  %v200_v3 = vcombine.high %v160_v0, %v192_v63 }
  0xa2   :  { %210 = vrot.lane.b32.xlu0 %v196_v61, %s334_s22  ;;  %214 = vrot.lane.b32.xlu1 %v197_v62, %s335_s23 }
  0xa6   :  { %218 = vrot.lane.b32.xlu0 %v198_v1, %s336_s24  ;;  %222 = vrot.lane.b32.xlu1 %v199_v2, %s337_s25 }
  0xaa   :  { %226 = vrot.lane.b32.xlu0 %v200_v3, %s338_s26 }
 0x110   :  { %v207_v4 = vpop.permute.xlu1 %206  ;;  %v203_v5 = vpop.permute.xlu0 %202 }
 0x111   :  { %v230_v6 = vsel %vm229_vm0, %v193_v58, %v203_v5 }
 0x112   :  { %v232_v8 = vsel %vm231_vm1, %v230_v6, %v207_v4 }
 0x114   :  { %v211_v7 = vpop.permute.xlu0 %210  ;;  %v215_v9 = vpop.permute.xlu1 %214 }
 0x115   :  { %v234_v10 = vsel %vm233_vm2, %v232_v8, %v211_v7 }
 0x116   :  { %v236_v11 = vsel %vm235_vm3, %v234_v10, %v215_v9 }
 0x118   :  { %v219_v12 = vpop.permute.xlu0 %218  ;;  %v223_v14 = vpop.permute.xlu1 %222 }
 0x119   :  { %v238_v13 = vsel %vm237_vm4, %v236_v11, %v219_v12 }
 0x11a   :  { %v240_v16 = vsel %vm239_vm5, %v238_v13, %v223_v14 }
 0x11c   :  { %v227_v17 = vpop.permute.xlu0 %226 }
 0x11d   :  { %v242_v18 = vsel %vm241_vm6, %v240_v16, %v227_v17 }
 0x11e   :  { %v250_v19 = vmul.f32 %v267_v15, %v242_v18 }
 0x120   :  { %251 = vst [vmem:[#allocation5] sm:$0x3f] %v250_v19 }
 0x121   :  { %313 = shalt.err (!%p310_p12)
}
 0x122   :  { %s314_s6 = scalar_lea.hbm %s384_s2, 128 }
 0x123   :  { %p315_p13 = scmp.ne.s32.totalorder %s384_s2, %s314_s6  ;;  %p318_p0 = scmp.lt.u32.totalorder %s314_s6, %s384_s2 }
 0x125   :  { %p320_p1 = pnand %p318_p0, %p315_p13 }
 0x127   :  { %323 = shalt.err (!%p320_p1)
}
 0x128   :  { %261 = dma.vmem_to_hbm [thread:$0]  %s259_s30, 128, %s384_s2, [#allocation4]  }
 0x129   :  { %326 = dma.done.wait [#allocation4], 128  }
 0x12a   :  { %327 = vsyncadd [#allocation4], 4294967168 }
 0x12b   :  { %265 = vsyncpa [#allocation3], 1 }
 0x12c   :  { %266 = vsyncpa [#allocation4], 1 }

</bundles_post_ra>
